<compile_context>
chip_gen: v5e
topology: v5e:2x2
jax: 0.10.0
libtpu: 0.0.40
codegen_flags: <defaults>
</compile_context>

<pallas_src>
import functools

import jax
import jax.numpy as jnp
from jax import lax
from jax.experimental import pallas as pl
from jax.experimental.pallas import tpu as pltpu

E_LAMBDA = 1e-4     # SimAM e_lambda
BN_EPS = 1e-5       # nn.BatchNorm2d default eps
_MXU_MIN_C1 = 16    # below this the 1x1 conv stays on the VPU (exact f32 broadcast-MACs)


def _conv_sws_kernel(w_ref, b_ref, m_ref, x_ref, o_ref, *, c1, hh, wh, e_lambda, use_mxu):
    """One batch element: 1x1 conv + folded-BN bias + SiLU + per-quadrant SimAM.

    w_ref: (C2, C1)   VMEM  -- conv weight with BN scale pre-folded
    b_ref: (C2, 1)    VMEM  -- folded BN bias
    m_ref: (4, S)     VMEM  -- f32 one-hot quadrant masks (TL, TR, BL, BR), resident
    x_ref: (1, C1, S) VMEM  -- S = H*W on the lane axis (lane-dense)
    o_ref: (1, C2, S) VMEM
    """
    cnt = hh * wh                    # elements per quadrant
    inv_cnt = 1.0 / cnt
    inv_n = 1.0 / (cnt - 1)          # SimAM's n = Hh*Wh - 1

    x_slab = x_ref[0]                # (C1, S)

    # --- 1x1 conv (BN scale folded into the weight) + bias ---
    if use_mxu:
        y = jnp.dot(w_ref[...], x_slab, preferred_element_type=jnp.float32) + b_ref[...]
    else:
        # Tiny contraction: exact f32 broadcast-MACs on the VPU over the lane-dense slab.
        y = w_ref[:, 0:1] * x_slab[0:1, :]
        for ci in range(1, c1):
            y = y + w_ref[:, ci:ci + 1] * x_slab[ci:ci + 1, :]
        y = y + b_ref[...]

    # --- SiLU ---
    # TODO(synk): if the bundle shows the logistic lowering doing exp + a full-precision divide
    # on the critical path, switch to 0.5 * tanh(0.5 * x) + 0.5 (one EUP op + cheap VALU).
    y = y * jax.nn.sigmoid(y)

    # --- SimAM per 2x2 quadrant: sums / sums-of-squares via lane reductions on one slab ---
    yy = y * y
    mu_e = None      # per-element quadrant mean,        (C2, S)
    inv_e = None     # per-element 1/(4*(vs/n + eps)),   (C2, S)
    for q in range(4):
        mq = m_ref[q:q + 1, :]                               # (1, S) f32 one-hot mask
        sy = jnp.sum(y * mq, axis=1, keepdims=True)          # (C2, 1)
        sq = jnp.sum(yy * mq, axis=1, keepdims=True)         # (C2, 1)
        mu = sy * inv_cnt
        vs = jnp.maximum(sq - sy * mu, 0.0)                  # sum((y-mu)^2), clamped (f32 cancellation)
        invd = 1.0 / (4.0 * (vs * inv_n + e_lambda))         # C2 scalar divides -> effectively free
        mu_e = mq * mu if mu_e is None else mu_e + mq * mu
        inv_e = mq * invd if inv_e is None else inv_e + mq * invd

    d = y - mu_e
    o_ref[0] = y * jax.nn.sigmoid(d * d * inv_e + 0.5)


def conv_sws_forward(x, weight, gamma, beta, running_mean, running_var):
    """x: (N, C1, H, W) f32; weight: (C2, C1) 1x1 conv weight (bias=False). Eval-mode BN."""
    N, C1, H, W = x.shape
    C2 = weight.shape[0]
    assert H % 2 == 0 and W % 2 == 0 and (H // 2) * (W // 2) > 1, \
        "SimAMWithSlicing kernel requires even H, W and quadrants with > 1 element"
    Hh, Wh = H // 2, W // 2
    S = H * W

    # Fold eval-mode BatchNorm into the conv weight / a per-channel bias.
    # TODO(synk): training-mode BN (batch statistics) not implemented; eval-mode semantics used.
    scale = gamma * lax.rsqrt(running_var + BN_EPS)                      # (C2,)
    w_scaled = (weight * scale[:, None]).astype(jnp.float32)             # (C2, C1)
    bias = (beta - running_mean * scale).astype(jnp.float32).reshape(C2, 1)

    # One-hot f32 quadrant masks over the flattened spatial axis (computed once, resident in VMEM).
    pos = jnp.arange(S, dtype=jnp.int32)
    top = (pos // W) < Hh
    left = (pos % W) < Wh
    quad_masks = jnp.stack(
        [top & left, top & ~left, ~top & left, ~top & ~left]).astype(jnp.float32)   # (4, S)

    x_flat = x.reshape(N, C1, S)     # free view: merges trailing H, W dims onto the lane axis

    kernel = functools.partial(_conv_sws_kernel, c1=C1, hh=Hh, wh=Wh,
                               e_lambda=E_LAMBDA, use_mxu=(C1 >= _MXU_MIN_C1))

    # TODO(synk): at production C2 / spatial sizes add an "arbitrary" C2-tile grid axis (with x's
    # index_map ignoring it so the input block stays resident) so the double-buffered blocks fit
    # v7x's 64 MiB VMEM, raise vmem_limit_bytes per generation, and use bf16 I/O on v5e/v6e to
    # halve HBM traffic (kept f32 here to match the f32 reference within 1e-5).
    out_flat = pl.pallas_call(
        kernel,
        out_shape=jax.ShapeDtypeStruct((N, C2, S), jnp.float32),
        grid=(N,),
        in_specs=[
            pl.BlockSpec((C2, C1), lambda n: (0, 0)),        # folded conv weight (resident)
            pl.BlockSpec((C2, 1), lambda n: (0, 0)),         # folded BN bias (resident)
            pl.BlockSpec((4, S), lambda n: (0, 0)),          # quadrant masks (resident)
            pl.BlockSpec((1, C1, S), lambda n: (n, 0, 0)),   # x for batch element n
        ],
        out_specs=pl.BlockSpec((1, C2, S), lambda n: (n, 0, 0)),
        compiler_params=pltpu.CompilerParams(
            dimension_semantics=("parallel",),
            vmem_limit_bytes=32 * 1024 * 1024,
        ),
    )(w_scaled, bias, quad_masks, x_flat)
    return out_flat.reshape(N, C2, H, W)


def _reference(x, weight, gamma, beta, running_mean, running_var):
    # Pure-JAX reference of the same forward (eval-mode BN), faithful to the PyTorch module.
    N, C1, H, W = x.shape
    y = jnp.einsum('nchw,oc->nohw', x, weight, precision=lax.Precision.HIGHEST)
    scale = gamma / jnp.sqrt(running_var + BN_EPS)
    bias = beta - running_mean * scale
    y = y * scale[None, :, None, None] + bias[None, :, None, None]
    y = y * jax.nn.sigmoid(y)
    Hh, Wh = H // 2, W // 2
    blocks = [y[:, :, :Hh, :Wh], y[:, :, :Hh, Wh:], y[:, :, Hh:, :Wh], y[:, :, Hh:, Wh:]]
    n = Hh * Wh - 1
    enh = []
    for b in blocks:
        d = (b - b.mean(axis=(2, 3), keepdims=True)) ** 2
        t = d / (4.0 * (d.sum(axis=(2, 3), keepdims=True) / n + E_LAMBDA)) + 0.5
        enh.append(b * jax.nn.sigmoid(t))
    top = jnp.concatenate([enh[0], enh[1]], axis=3)
    bot = jnp.concatenate([enh[2], enh[3]], axis=3)
    return jnp.concatenate([top, bot], axis=2)


if __name__ == "__main__":
    key = jax.random.PRNGKey(0)
    k_x, k_w, k_g, k_b, k_m, k_v = jax.random.split(key, 6)

    N, C1, C2, H, W = 2, 4, 8, 16, 16
    x = jax.random.normal(k_x, (N, C1, H, W), dtype=jnp.float32)
    weight = 0.1 * jax.random.normal(k_w, (C2, C1), dtype=jnp.float32)      # 1x1 conv weight (bias=False)
    gamma = 1.0 + 0.1 * jax.random.normal(k_g, (C2,), dtype=jnp.float32)    # BN affine weight
    beta = 0.1 * jax.random.normal(k_b, (C2,), dtype=jnp.float32)           # BN affine bias
    running_mean = 0.1 * jax.random.normal(k_m, (C2,), dtype=jnp.float32)   # BN running mean
    running_var = 1.0 + 0.1 * jax.random.uniform(k_v, (C2,), dtype=jnp.float32)  # BN running var

    out = conv_sws_forward(x, weight, gamma, beta, running_mean, running_var)
    out = jax.block_until_ready(out)

    ref = _reference(x, weight, gamma, beta, running_mean, running_var)
    assert out.shape == (N, C2, H, W)
    assert jnp.allclose(out, ref, atol=1e-5, rtol=1e-5), "mismatch vs reference"

    print("KERNEL_OK")
</pallas_src>

<mosaic_0001>
module attributes {stable_mosaic.version = 11 : i64} {
  func.func @_conv_sws_kernel(%arg0: i32, %arg1: memref<8x4xf32, #tpu.memory_space<vmem>>, %arg2: memref<8x1xf32, #tpu.memory_space<vmem>>, %arg3: memref<4x256xf32, #tpu.memory_space<vmem>>, %arg4: memref<1x4x256xf32, #tpu.memory_space<vmem>>, %arg5: memref<1x8x256xf32, #tpu.memory_space<vmem>>) attributes {dimension_semantics = [#tpu.dimension_semantics<parallel>], iteration_bounds = array<i64: 2>, scalar_prefetch = 0 : i64, scratch_operands = 0 : i64, tpu.core_type = #tpu.core_type<tc>, window_params = [{pipeline_mode = #tpu.pipeline_mode<synchronous>, transform_indices = @transform_0, window_bounds = array<i64: 8, 4>}, {pipeline_mode = #tpu.pipeline_mode<synchronous>, transform_indices = @transform_1, window_bounds = array<i64: 8, 1>}, {pipeline_mode = #tpu.pipeline_mode<synchronous>, transform_indices = @transform_2, window_bounds = array<i64: 4, 256>}, {transform_indices = @transform_3, window_bounds = array<i64: 1, 4, 256>}, {transform_indices = @transform_4, window_bounds = array<i64: 1, 8, 256>}]} {
    %c0 = arith.constant 0 : index
    %c0_0 = arith.constant 0 : index
    %c0_1 = arith.constant 0 : index
    %0 = vector.load %arg4[%c0, %c0_0, %c0_1] : memref<1x4x256xf32, #tpu.memory_space<vmem>>, vector<1x4x256xf32>
    %1 = vector.shape_cast %0 : vector<1x4x256xf32> to vector<4x256xf32>
    %c0_2 = arith.constant 0 : index
    %c0_3 = arith.constant 0 : index
    %2 = vector.load %arg1[%c0_2, %c0_3] : memref<8x4xf32, #tpu.memory_space<vmem>>, vector<8x1xf32>
    %3 = vector.extract_strided_slice %1 {offsets = [0, 0], sizes = [1, 256], strides = [1, 1]} : vector<4x256xf32> to vector<1x256xf32>
    %4 = vector.broadcast %2 : vector<8x1xf32> to vector<8x256xf32>
    %5 = vector.broadcast %3 : vector<1x256xf32> to vector<8x256xf32>
    %6 = arith.mulf %4, %5 : vector<8x256xf32>
    %c0_4 = arith.constant 0 : index
    %c1 = arith.constant 1 : index
    %7 = vector.load %arg1[%c0_4, %c1] : memref<8x4xf32, #tpu.memory_space<vmem>>, vector<8x1xf32>
    %8 = vector.extract_strided_slice %1 {offsets = [1, 0], sizes = [1, 256], strides = [1, 1]} : vector<4x256xf32> to vector<1x256xf32>
    %9 = vector.broadcast %7 : vector<8x1xf32> to vector<8x256xf32>
    %10 = vector.broadcast %8 : vector<1x256xf32> to vector<8x256xf32>
    %11 = arith.mulf %9, %10 : vector<8x256xf32>
    %12 = arith.addf %6, %11 : vector<8x256xf32>
    %c0_5 = arith.constant 0 : index
    %c2 = arith.constant 2 : index
    %13 = vector.load %arg1[%c0_5, %c2] : memref<8x4xf32, #tpu.memory_space<vmem>>, vector<8x1xf32>
    %14 = vector.extract_strided_slice %1 {offsets = [2, 0], sizes = [1, 256], strides = [1, 1]} : vector<4x256xf32> to vector<1x256xf32>
    %15 = vector.broadcast %13 : vector<8x1xf32> to vector<8x256xf32>
    %16 = vector.broadcast %14 : vector<1x256xf32> to vector<8x256xf32>
    %17 = arith.mulf %15, %16 : vector<8x256xf32>
    %18 = arith.addf %12, %17 : vector<8x256xf32>
    %c0_6 = arith.constant 0 : index
    %c3 = arith.constant 3 : index
    %19 = vector.load %arg1[%c0_6, %c3] : memref<8x4xf32, #tpu.memory_space<vmem>>, vector<8x1xf32>
    %20 = vector.extract_strided_slice %1 {offsets = [3, 0], sizes = [1, 256], strides = [1, 1]} : vector<4x256xf32> to vector<1x256xf32>
    %21 = vector.broadcast %19 : vector<8x1xf32> to vector<8x256xf32>
    %22 = vector.broadcast %20 : vector<1x256xf32> to vector<8x256xf32>
    %23 = arith.mulf %21, %22 : vector<8x256xf32>
    %24 = arith.addf %18, %23 : vector<8x256xf32>
    %c0_7 = arith.constant 0 : index
    %c0_8 = arith.constant 0 : index
    %25 = vector.load %arg2[%c0_7, %c0_8] : memref<8x1xf32, #tpu.memory_space<vmem>>, vector<8x1xf32>
    %26 = vector.broadcast %25 : vector<8x1xf32> to vector<8x256xf32>
    %27 = arith.addf %24, %26 : vector<8x256xf32>
    %28 = arith.negf %27 : vector<8x256xf32>
    %29 = math.exp %28 : vector<8x256xf32>
    %cst = arith.constant 1.000000e+00 : f32
    %30 = vector.broadcast %cst : f32 to vector<8x256xf32>
    %31 = arith.addf %30, %29 : vector<8x256xf32>
    %32 = arith.divf %30, %31 : vector<8x256xf32>
    %33 = arith.mulf %27, %32 : vector<8x256xf32>
    %34 = arith.mulf %33, %33 : vector<8x256xf32>
    %c0_9 = arith.constant 0 : index
    %c0_10 = arith.constant 0 : index
    %35 = vector.load %arg3[%c0_9, %c0_10] : memref<4x256xf32, #tpu.memory_space<vmem>>, vector<1x256xf32>
    %36 = vector.broadcast %35 : vector<1x256xf32> to vector<8x256xf32>
    %37 = arith.mulf %33, %36 : vector<8x256xf32>
    %cst_11 = arith.constant dense<0.000000e+00> : vector<8xf32>
    %38 = vector.multi_reduction <add>, %37, %cst_11 [1] : vector<8x256xf32> to vector<8xf32>
    %39 = vector.shape_cast %38 : vector<8xf32> to vector<8x1xf32>
    %40 = vector.broadcast %35 : vector<1x256xf32> to vector<8x256xf32>
    %41 = arith.mulf %34, %40 : vector<8x256xf32>
    %cst_12 = arith.constant dense<0.000000e+00> : vector<8xf32>
    %42 = vector.multi_reduction <add>, %41, %cst_12 [1] : vector<8x256xf32> to vector<8xf32>
    %43 = vector.shape_cast %42 : vector<8xf32> to vector<8x1xf32>
    %cst_13 = arith.constant 1.562500e-02 : f32
    %44 = vector.broadcast %cst_13 : f32 to vector<8x1xf32>
    %45 = arith.mulf %39, %44 : vector<8x1xf32>
    %46 = arith.mulf %39, %45 : vector<8x1xf32>
    %47 = arith.subf %43, %46 : vector<8x1xf32>
    %cst_14 = arith.constant 0.000000e+00 : f32
    %48 = vector.broadcast %cst_14 : f32 to vector<8x1xf32>
    %49 = arith.maximumf %47, %48 : vector<8x1xf32>
    %cst_15 = arith.constant 0.0158730168 : f32
    %50 = vector.broadcast %cst_15 : f32 to vector<8x1xf32>
    %51 = arith.mulf %49, %50 : vector<8x1xf32>
    %cst_16 = arith.constant 9.99999974E-5 : f32
    %52 = vector.broadcast %cst_16 : f32 to vector<8x1xf32>
    %53 = arith.addf %51, %52 : vector<8x1xf32>
    %cst_17 = arith.constant 4.000000e+00 : f32
    %54 = vector.broadcast %cst_17 : f32 to vector<8x1xf32>
    %55 = arith.mulf %54, %53 : vector<8x1xf32>
    %cst_18 = arith.constant 1.000000e+00 : f32
    %56 = vector.broadcast %cst_18 : f32 to vector<8x1xf32>
    %57 = arith.divf %56, %55 : vector<8x1xf32>
    %58 = vector.broadcast %35 : vector<1x256xf32> to vector<8x256xf32>
    %59 = vector.broadcast %45 : vector<8x1xf32> to vector<8x256xf32>
    %60 = arith.mulf %58, %59 : vector<8x256xf32>
    %61 = vector.broadcast %35 : vector<1x256xf32> to vector<8x256xf32>
    %62 = vector.broadcast %57 : vector<8x1xf32> to vector<8x256xf32>
    %63 = arith.mulf %61, %62 : vector<8x256xf32>
    %c1_19 = arith.constant 1 : index
    %c0_20 = arith.constant 0 : index
    %64 = vector.load %arg3[%c1_19, %c0_20] : memref<4x256xf32, #tpu.memory_space<vmem>>, vector<1x256xf32>
    %65 = vector.broadcast %64 : vector<1x256xf32> to vector<8x256xf32>
    %66 = arith.mulf %33, %65 : vector<8x256xf32>
    %cst_21 = arith.constant dense<0.000000e+00> : vector<8xf32>
    %67 = vector.multi_reduction <add>, %66, %cst_21 [1] : vector<8x256xf32> to vector<8xf32>
    %68 = vector.shape_cast %67 : vector<8xf32> to vector<8x1xf32>
    %69 = vector.broadcast %64 : vector<1x256xf32> to vector<8x256xf32>
    %70 = arith.mulf %34, %69 : vector<8x256xf32>
    %cst_22 = arith.constant dense<0.000000e+00> : vector<8xf32>
    %71 = vector.multi_reduction <add>, %70, %cst_22 [1] : vector<8x256xf32> to vector<8xf32>
    %72 = vector.shape_cast %71 : vector<8xf32> to vector<8x1xf32>
    %cst_23 = arith.constant 1.562500e-02 : f32
    %73 = vector.broadcast %cst_23 : f32 to vector<8x1xf32>
    %74 = arith.mulf %68, %73 : vector<8x1xf32>
    %75 = arith.mulf %68, %74 : vector<8x1xf32>
    %76 = arith.subf %72, %75 : vector<8x1xf32>
    %cst_24 = arith.constant 0.000000e+00 : f32
    %77 = vector.broadcast %cst_24 : f32 to vector<8x1xf32>
    %78 = arith.maximumf %76, %77 : vector<8x1xf32>
    %cst_25 = arith.constant 0.0158730168 : f32
    %79 = vector.broadcast %cst_25 : f32 to vector<8x1xf32>
    %80 = arith.mulf %78, %79 : vector<8x1xf32>
    %cst_26 = arith.constant 9.99999974E-5 : f32
    %81 = vector.broadcast %cst_26 : f32 to vector<8x1xf32>
    %82 = arith.addf %80, %81 : vector<8x1xf32>
    %cst_27 = arith.constant 4.000000e+00 : f32
    %83 = vector.broadcast %cst_27 : f32 to vector<8x1xf32>
    %84 = arith.mulf %83, %82 : vector<8x1xf32>
    %cst_28 = arith.constant 1.000000e+00 : f32
    %85 = vector.broadcast %cst_28 : f32 to vector<8x1xf32>
    %86 = arith.divf %85, %84 : vector<8x1xf32>
    %87 = vector.broadcast %64 : vector<1x256xf32> to vector<8x256xf32>
    %88 = vector.broadcast %74 : vector<8x1xf32> to vector<8x256xf32>
    %89 = arith.mulf %87, %88 : vector<8x256xf32>
    %90 = arith.addf %60, %89 : vector<8x256xf32>
    %91 = vector.broadcast %64 : vector<1x256xf32> to vector<8x256xf32>
    %92 = vector.broadcast %86 : vector<8x1xf32> to vector<8x256xf32>
    %93 = arith.mulf %91, %92 : vector<8x256xf32>
    %94 = arith.addf %63, %93 : vector<8x256xf32>
    %c2_29 = arith.constant 2 : index
    %c0_30 = arith.constant 0 : index
    %95 = vector.load %arg3[%c2_29, %c0_30] : memref<4x256xf32, #tpu.memory_space<vmem>>, vector<1x256xf32>
    %96 = vector.broadcast %95 : vector<1x256xf32> to vector<8x256xf32>
    %97 = arith.mulf %33, %96 : vector<8x256xf32>
    %cst_31 = arith.constant dense<0.000000e+00> : vector<8xf32>
    %98 = vector.multi_reduction <add>, %97, %cst_31 [1] : vector<8x256xf32> to vector<8xf32>
    %99 = vector.shape_cast %98 : vector<8xf32> to vector<8x1xf32>
    %100 = vector.broadcast %95 : vector<1x256xf32> to vector<8x256xf32>
    %101 = arith.mulf %34, %100 : vector<8x256xf32>
    %cst_32 = arith.constant dense<0.000000e+00> : vector<8xf32>
    %102 = vector.multi_reduction <add>, %101, %cst_32 [1] : vector<8x256xf32> to vector<8xf32>
    %103 = vector.shape_cast %102 : vector<8xf32> to vector<8x1xf32>
    %cst_33 = arith.constant 1.562500e-02 : f32
    %104 = vector.broadcast %cst_33 : f32 to vector<8x1xf32>
    %105 = arith.mulf %99, %104 : vector<8x1xf32>
    %106 = arith.mulf %99, %105 : vector<8x1xf32>
    %107 = arith.subf %103, %106 : vector<8x1xf32>
    %cst_34 = arith.constant 0.000000e+00 : f32
    %108 = vector.broadcast %cst_34 : f32 to vector<8x1xf32>
    %109 = arith.maximumf %107, %108 : vector<8x1xf32>
    %cst_35 = arith.constant 0.0158730168 : f32
    %110 = vector.broadcast %cst_35 : f32 to vector<8x1xf32>
    %111 = arith.mulf %109, %110 : vector<8x1xf32>
    %cst_36 = arith.constant 9.99999974E-5 : f32
    %112 = vector.broadcast %cst_36 : f32 to vector<8x1xf32>
    %113 = arith.addf %111, %112 : vector<8x1xf32>
    %cst_37 = arith.constant 4.000000e+00 : f32
    %114 = vector.broadcast %cst_37 : f32 to vector<8x1xf32>
    %115 = arith.mulf %114, %113 : vector<8x1xf32>
    %cst_38 = arith.constant 1.000000e+00 : f32
    %116 = vector.broadcast %cst_38 : f32 to vector<8x1xf32>
    %117 = arith.divf %116, %115 : vector<8x1xf32>
    %118 = vector.broadcast %95 : vector<1x256xf32> to vector<8x256xf32>
    %119 = vector.broadcast %105 : vector<8x1xf32> to vector<8x256xf32>
    %120 = arith.mulf %118, %119 : vector<8x256xf32>
    %121 = arith.addf %90, %120 : vector<8x256xf32>
    %122 = vector.broadcast %95 : vector<1x256xf32> to vector<8x256xf32>
    %123 = vector.broadcast %117 : vector<8x1xf32> to vector<8x256xf32>
    %124 = arith.mulf %122, %123 : vector<8x256xf32>
    %125 = arith.addf %94, %124 : vector<8x256xf32>
    %c3_39 = arith.constant 3 : index
    %c0_40 = arith.constant 0 : index
    %126 = vector.load %arg3[%c3_39, %c0_40] : memref<4x256xf32, #tpu.memory_space<vmem>>, vector<1x256xf32>
    %127 = vector.broadcast %126 : vector<1x256xf32> to vector<8x256xf32>
    %128 = arith.mulf %33, %127 : vector<8x256xf32>
    %cst_41 = arith.constant dense<0.000000e+00> : vector<8xf32>
    %129 = vector.multi_reduction <add>, %128, %cst_41 [1] : vector<8x256xf32> to vector<8xf32>
    %130 = vector.shape_cast %129 : vector<8xf32> to vector<8x1xf32>
    %131 = vector.broadcast %126 : vector<1x256xf32> to vector<8x256xf32>
    %132 = arith.mulf %34, %131 : vector<8x256xf32>
    %cst_42 = arith.constant dense<0.000000e+00> : vector<8xf32>
    %133 = vector.multi_reduction <add>, %132, %cst_42 [1] : vector<8x256xf32> to vector<8xf32>
    %134 = vector.shape_cast %133 : vector<8xf32> to vector<8x1xf32>
    %cst_43 = arith.constant 1.562500e-02 : f32
    %135 = vector.broadcast %cst_43 : f32 to vector<8x1xf32>
    %136 = arith.mulf %130, %135 : vector<8x1xf32>
    %137 = arith.mulf %130, %136 : vector<8x1xf32>
    %138 = arith.subf %134, %137 : vector<8x1xf32>
    %cst_44 = arith.constant 0.000000e+00 : f32
    %139 = vector.broadcast %cst_44 : f32 to vector<8x1xf32>
    %140 = arith.maximumf %138, %139 : vector<8x1xf32>
    %cst_45 = arith.constant 0.0158730168 : f32
    %141 = vector.broadcast %cst_45 : f32 to vector<8x1xf32>
    %142 = arith.mulf %140, %141 : vector<8x1xf32>
    %cst_46 = arith.constant 9.99999974E-5 : f32
    %143 = vector.broadcast %cst_46 : f32 to vector<8x1xf32>
    %144 = arith.addf %142, %143 : vector<8x1xf32>
    %cst_47 = arith.constant 4.000000e+00 : f32
    %145 = vector.broadcast %cst_47 : f32 to vector<8x1xf32>
    %146 = arith.mulf %145, %144 : vector<8x1xf32>
    %cst_48 = arith.constant 1.000000e+00 : f32
    %147 = vector.broadcast %cst_48 : f32 to vector<8x1xf32>
    %148 = arith.divf %147, %146 : vector<8x1xf32>
    %149 = vector.broadcast %126 : vector<1x256xf32> to vector<8x256xf32>
    %150 = vector.broadcast %136 : vector<8x1xf32> to vector<8x256xf32>
    %151 = arith.mulf %149, %150 : vector<8x256xf32>
    %152 = arith.addf %121, %151 : vector<8x256xf32>
    %153 = vector.broadcast %126 : vector<1x256xf32> to vector<8x256xf32>
    %154 = vector.broadcast %148 : vector<8x1xf32> to vector<8x256xf32>
    %155 = arith.mulf %153, %154 : vector<8x256xf32>
    %156 = arith.addf %125, %155 : vector<8x256xf32>
    %157 = arith.subf %33, %152 : vector<8x256xf32>
    %158 = arith.mulf %157, %157 : vector<8x256xf32>
    %159 = arith.mulf %158, %156 : vector<8x256xf32>
    %cst_49 = arith.constant 5.000000e-01 : f32
    %160 = vector.broadcast %cst_49 : f32 to vector<8x256xf32>
    %161 = arith.addf %159, %160 : vector<8x256xf32>
    %162 = arith.negf %161 : vector<8x256xf32>
    %163 = math.exp %162 : vector<8x256xf32>
    %cst_50 = arith.constant 1.000000e+00 : f32
    %164 = vector.broadcast %cst_50 : f32 to vector<8x256xf32>
    %165 = arith.addf %164, %163 : vector<8x256xf32>
    %166 = arith.divf %164, %165 : vector<8x256xf32>
    %167 = arith.mulf %33, %166 : vector<8x256xf32>
    %c0_51 = arith.constant 0 : index
    %c0_52 = arith.constant 0 : index
    %c0_53 = arith.constant 0 : index
    %168 = vector.load %arg5[%c0_51, %c0_52, %c0_53] : memref<1x8x256xf32, #tpu.memory_space<vmem>>, vector<1x8x256xf32>
    %169 = vector.shape_cast %168 : vector<1x8x256xf32> to vector<8x256xf32>
    %170 = vector.shape_cast %167 : vector<8x256xf32> to vector<1x8x256xf32>
    tpu.vector_store %arg5[%c0_51, %c0_52, %c0_53], %170 {strides = array<i32>} : memref<1x8x256xf32, #tpu.memory_space<vmem>>, vector<1x8x256xf32>,
    return
  }
  func.func @transform_0(%arg0: i32) -> (i32, i32) {
    %c0_i32 = arith.constant 0 : i32
    %c0_i32_0 = arith.constant 0 : i32
    %c0_i32_1 = arith.constant 0 : i32
    return %c0_i32, %c0_i32_0 : i32, i32
  }
  func.func @transform_1(%arg0: i32) -> (i32, i32) {
    %c0_i32 = arith.constant 0 : i32
    %c0_i32_0 = arith.constant 0 : i32
    %c0_i32_1 = arith.constant 0 : i32
    return %c0_i32, %c0_i32_0 : i32, i32
  }
  func.func @transform_2(%arg0: i32) -> (i32, i32) {
    %c0_i32 = arith.constant 0 : i32
    %c0_i32_0 = arith.constant 0 : i32
    %c0_i32_1 = arith.constant 0 : i32
    return %c0_i32, %c0_i32_0 : i32, i32
  }
  func.func @transform_3(%arg0: i32) -> (i32, i32, i32) {
    %c0_i32 = arith.constant 0 : i32
    %c0_i32_0 = arith.constant 0 : i32
    %c0_i32_1 = arith.constant 0 : i32
    return %arg0, %c0_i32, %c0_i32_0 : i32, i32, i32
  }
  func.func @transform_4(%arg0: i32) -> (i32, i32, i32) {
    %c0_i32 = arith.constant 0 : i32
    %c0_i32_0 = arith.constant 0 : i32
    %c0_i32_1 = arith.constant 0 : i32
    return %arg0, %c0_i32, %c0_i32_0 : i32, i32, i32
  }
}

</mosaic_0001>

<bundles_post_ra>
// kernel: tpu_custom_call.1
= control target key start
LH: loop header
LB: loop body
LE: loop exit
PB: predicated region body
PF: predicated region fallthrough
CT: control target
= control target key end

     0   :  { %9 = vsyncpa [#allocation3], 0  ;;  %s1100_s0 = inlined_call_operand.vmem [shape: f32[8,4], index: 0, kind: input, shape index: {}]   ;;  %s1101_s1 = inlined_call_operand.vmem [shape: f32[8,1], index: 1, kind: input, shape index: {}]   ;;  %s1102_s2 = inlined_call_operand.hbm [shape: f32[4,256], index: 2, kind: input, shape index: {}]   ;;  %s1103_s3 = inlined_call_operand.vmem [shape: f32[2,4,256], index: 3, kind: input, shape index: {}]   ;;  %s1104_s4 = inlined_call_operand.hbm [shape: f32[2,8,256], index: 4, kind: output, shape index: {}]  }
   0x1   :  { %10 = vsyncpa [#allocation4], 0 }
   0x2   :  { %12 = vsyncpa [#allocation4 + $0x1], 0  ;;  %s872_s15 = smov 0   ;;  %s874_s16 = smov 0  }
   0x3   :  { %s876_s17 = smov 0   ;;  %s878_s18 = smov 0  }
   0x4 LB: > { %s893_s19 = sadd.s32 4294967295, %s840_s18   ;;  %s640_s20 = sadd.s32 4294967294, %s840_s18   ;;  %s840_s18 = sphi %s878_s18, %s1116_s18   ;;  %s836_s17 = sphi %s876_s17, %s1115_s17   ;;  %s832_s16 = sphi %s874_s16, %s1114_s16   ;;  %s828_s15 = sphi %s872_s15, %s1113_s15  }
   0x5   : > { %s897_s21 = sadd.s32 1, %s840_s18   ;;  %s114_s22 = sadd.s32 1, %s836_s17 }
   0x6   : > { %s111_s23 = ssub.s32 %s840_s18, %s897_s21  ;;  %p124_p0 = scmp.ne.s32.totalorder %s836_s17, %s832_s16 }
   0x7   : > { %p112_p1 = scmp.eq.s32.totalorder %s111_s23, 0  ;;  %p125_p2 = scmp.eq.s32.totalorder %s893_s19, 1 }
   0x8   : > { %p130_p3 = scmp.ne.s32.totalorder %s832_s16, %s828_s15  ;;  %p131_p4 = scmp.eq.s32.totalorder %s640_s20, 1 }
   0x9   : > { %s908_s24 = scalar_select %p112_p1, %s836_s17, %s114_s22  }
   0xa   : > { %p910_p5 = por %p125_p2, %p124_p0  ;;  %p914_p6 = por %p131_p4, %p130_p3 }
   0xb   : > { %p641_p7 = scmp.ge.s32.totalorder %s840_s18, 1  ;;  %p138_p8 = scmp.lt.s32.totalorder %s840_s18, 3 }
   0xc   : > { %p674_p9 = scmp.eq.s32.totalorder %s893_s19, 0  ;;  %s156_s29 = sshll.u32 %s1102_s2, 4  ;;  %s157_s29 = int_to_ptr.hbm [resolvable:$true] %s156_s29 }
   0xd   : > { %p139_p10 = pnand %p641_p7, %p138_p8  ;;  %s842_s30 = smov [#allocation2]  }
   0xe   : > { %s158_s5 = sshll.u32 %s842_s30, 4  ;;  %s159_s5 = int_to_ptr.vmem [resolvable:$true] %s158_s5 }
   0xf   : > { %p666_p11 = pneg %p139_p10  ;;  %179 = sbr.rel (%p139_p10) target bundleno = 404 (0x194), region = 36 }
  0x11   : > { %p667_p12 = pnand %p674_p9, %p666_p11 }
  0x13   : > { %669 = dma.hbm_to_vmem [thread:$0]  (!%p667_p12), %s157_s29, 128, %s159_s5, [#allocation3]  }
  0x14   : > { %819 = dma.done.wait (%p674_p9), [#allocation3], 128  }
  0x15   : > { %821 = vsyncadd (%p674_p9), [#allocation3], 4294967168  ;;  %v843_v0 = vmov 0   ;;  %v844_v1 = vmov 2   ;;  %v212_v2 = vld [vmem:[%s1100_s0] sm:$0xff]  ;;  %v845_v4 = vmov 1  }
  0x16   : > { %714 = vset.pattern.permute.xlu0 %v843_v0  ;;  %716 = vset.pattern.permute.xlu1 %v844_v1  ;;  %v269_v3 = vld [vmem:[%s1101_s1] sm:$0xff]  ;;  %v846_v5 = vmov 3   ;;  %p206_p13 = scmp.lt.s32.totalorder %s893_s19, 1  ;;  %s203_s20 = sand.u32 1, %s832_s16  }
  0x17   : > { %718 = vset.pattern.permute.xlu2 %v843_v0  ;;  %215 = vperm.xlu0 %714, %v212_v2   ;;  %v409_v55 = vld [vmem:[#allocation2 + $0x2] ss:$4 sm:$0x3]  ;;  %v362_v58 = vld [vmem:[#allocation2 + $0x1] ss:$4 sm:$0x3] }
  0x18   : > { %242 = vperm.xlu1 %716, %v212_v2   ;;  %272 = vperm.xlu2 %718, %v269_v3   ;;  %s207_s10 = scalar_select %p206_p13, %s893_s19, 1  ;;  %v319_v1 = vld [vmem:[#allocation2] ss:$4 sm:$0x3]  ;;  %v937_v3 = vperm.slane %v409_v55, 1 }
  0x19   : > { %s646_s22 = sshll.u32 %s203_s20, 4  ;;  %s659_s23 = sshll.u32 %s893_s19, 4 }
  0x1a   : > { %s658_s11 = sshll.u32 %s207_s10, 3  ;;  %s564_s29 = scalar_lea.hbm %s1104_s4, %s659_s23 }
  0x1b   : > { %s210_s14 = scalar_lea.vmem %s1103_s3, %s658_s11  ;;  %s205_s19 = scalar_lea.vmem [#allocation5], %s646_s22 }
  0x1c   : > { %v211_v6 = vld [vmem:[%s210_s14] sm:$0xff]  ;;  %s566_s30 = sshll.u32 %s205_s19, 4  ;;  %s568_s5 = sshll.u32 %s564_s29, 4  ;;  %s567_s30 = int_to_ptr.vmem [resolvable:$true] %s566_s30  ;;  %s569_s5 = int_to_ptr.hbm [resolvable:$true] %s568_s5 }
  0x1d   : > { %v219_v9 = vperm.slane %v211_v6, 0  ;;  %v220_v10 = vperm.slane %v211_v6, 4  ;;  %v231_v11 = vperm.slane %v211_v6, 1  ;;  %v232_v12 = vperm.slane %v211_v6, 5  ;;  %s553_s6 = scalar_lea.sflag [#allocation4], %s203_s20  ;;  %s788_s7 = sshra.s32 %s569_s5, 4  ;;  %s789_s7 = int_to_ptr.hbm [resolvable:$true] %s788_s7 }
  0x1e   : > { %v245_v13 = vperm.slane %v211_v6, 2  ;;  %v246_v14 = vperm.slane %v211_v6, 6  ;;  %v259_v15 = vperm.slane %v211_v6, 3  ;;  %v260_v16 = vperm.slane %v211_v6, 7  ;;  %s790_s8 = scalar_lea.hbm %s789_s7, 16  ;;  %s794_s11 = scalar_lea.hbm %s1104_s4, 32 }
  0x1f   : > { %715 = vset.pattern.permute.xlu0 %v845_v4  ;;  %v223_v17 = vperm.slane %v219_v9, 0  ;;  %v224_v18 = vperm.slane %v220_v10, 0  ;;  %v235_v19 = vperm.slane %v231_v11, 1  ;;  %v236_v20 = vperm.slane %v232_v12, 1  ;;  %p791_p0 = scmp.ne.s32.totalorder %s789_s7, %s790_s8  ;;  %p795_p3 = scmp.lt.s32.totalorder %s789_s7, %s1104_s4 }
  0x20   : > { %717 = vset.pattern.permute.xlu1 %v846_v5  ;;  %228 = vperm.xlu0 %715, %v212_v2   ;;  %v249_v21 = vperm.slane %v245_v13, 2  ;;  %v250_v22 = vperm.slane %v246_v14, 2  ;;  %v263_v23 = vperm.slane %v259_v15, 3  ;;  %v264_v24 = vperm.slane %v260_v16, 3  ;;  %p796_p4 = scmp.lt.s32.totalorder %s794_s11, %s790_s8 }
  0x21   : > { %256 = vperm.xlu1 %717, %v212_v2   ;;  %v939_v4 = vperm.slane %v362_v58, 0  ;;  %v944_v10 = vperm.slane %v319_v1, 0  ;;  %v946_v13 = vperm.slane %v319_v1, 1  ;;  %p792_p1 = pnand %p791_p0, %p910_p5 }
  0x22   : > { %p797_p7 = por %p796_p4, %p795_p3 }
  0x23   : > { %p793_p2 = pneg %p792_p1 }
  0x25   : > { %p798_p8 = pnand %p797_p7, %p793_p2 }
  0x28   : > { %719 = vset.pattern.permute.xlu0 %v843_v0  ;;  %v935_v0 = vperm.slane %v409_v55, 0 }
  0x72   : > { %v273_v39 = vpop.permute.xlu2 %272 }
  0x89   : > { %v216_v7 = vpop.permute.xlu0 %215 }
  0x8a   : > { %v243_v8 = vpop.permute.xlu1 %242  ;;  %v225_v27 = vmul.f32 %v223_v17, %v216_v7  ;;  %v226_v28 = vmul.f32 %v224_v18, %v216_v7  ;;  %v941_v7 = vperm.slane %v362_v58, 1  ;;  %v456_v17 = vld [vmem:[#allocation2 + $0x3] ss:$4 sm:$0x3] }
  0x8b   : > { %v251_v31 = vmul.f32 %v249_v21, %v243_v8  ;;  %v252_v32 = vmul.f32 %v250_v22, %v243_v8 }
  0x92   : > { %v229_v25 = vpop.permute.xlu0 %228 }
  0x93   : > { %v257_v26 = vpop.permute.xlu1 %256  ;;  %v237_v29 = vmul.f32 %v235_v19, %v229_v25  ;;  %v238_v30 = vmul.f32 %v236_v20, %v229_v25  ;;  %v966_v25 = vperm.slane %v456_v17, 1 }
  0x94   : > { %v265_v35 = vmul.f32 %v263_v23, %v257_v26  ;;  %v266_v36 = vmul.f32 %v264_v24, %v257_v26  ;;  %v964_v24 = vperm.slane %v456_v17, 0 }
  0x95   : > { %v239_v33 = vadd.f32 %v237_v29, %v225_v27  ;;  %v240_v34 = vadd.f32 %v238_v30, %v226_v28 }
  0x97   : > { %v253_v37 = vadd.f32 %v251_v31, %v239_v33  ;;  %v254_v38 = vadd.f32 %v252_v32, %v240_v34 }
  0x99   : > { %v267_v40 = vadd.f32 %v265_v35, %v253_v37  ;;  %v268_v41 = vadd.f32 %v266_v36, %v254_v38 }
  0x9b   : > { %v275_v42 = vadd.f32 %v273_v39, %v267_v40  ;;  %v276_v43 = vadd.f32 %v273_v39, %v268_v41 }
  0x9d   : > { %v649_v44 = vmul.f32 -1.442695, %v275_v42  ;;  %v650_v45 = vmul.f32 -1.442695, %v276_v43 }
  0x9f   : > { %720 = vpow2.f32 %v649_v44 }
  0xa0   : > { %722 = vpow2.f32 %v650_v45 }
  0xa5   : > { %v721_v46 = vpop.eup %720 }
  0xa6   : > { %v723_v47 = vpop.eup %722  ;;  %v283_v48 = vadd.f32 1.0, %v721_v46 }
  0xa7   : > { %v284_v49 = vadd.f32 1.0, %v723_v47 }
  0xa8   : > { %724 = vrcp.f32 %v283_v48  ;;  %v296_v56 = vand.u32 2147483648, %v283_v48  ;;  %v294_v60 = vand.u32 2147483647, %v283_v48  ;;  %vm290_vm2 = vweird.f32 %v283_v48 }
  0xa9   : > { %726 = vrcp.f32 %v284_v49  ;;  %v311_v61 = vand.u32 2147483648, %v284_v49  ;;  %v309_v63 = vand.u32 2147483647, %v284_v49  ;;  %vm305_vm4 = vweird.f32 %v284_v49 }
  0xaa   : > { %v297_v5 = vor.u32 1.1754944e-38, %v296_v56  ;;  %vm295_vm5 = vcmp.eq.f32.partialorder %v294_v60, 8.507059e+37 }
  0xab   : > { %v312_v9 = vor.u32 1.1754944e-38, %v311_v61  ;;  %vm310_vm7 = vcmp.eq.f32.partialorder %v309_v63, 8.507059e+37 }
  0xae   : > { %v725_v50 = vpop.eup %724 }
  0xaf   : > { %v727_v51 = vpop.eup %726  ;;  %v286_v52 = vmul.f32 %v725_v50, %v283_v48  ;;  %vm291_vm0 = vweird.f32 %v725_v50 }
  0xb0   : > { %v301_v53 = vmul.f32 %v727_v51, %v284_v49  ;;  %vm306_vm1 = vweird.f32 %v727_v51  ;;  %vm292_vm3 = vmor %vm290_vm2, %vm291_vm0 }
  0xb1   : > { %v287_v54 = vsub.f32 1.0, %v286_v52  ;;  %vm307_vm6 = vmor %vm305_vm4, %vm306_vm1 }
  0xb2   : > { %v302_v57 = vsub.f32 1.0, %v301_v53 }
  0xb3   : > { %v288_v59 = vmul.f32 %v725_v50, %v287_v54 }
  0xb4   : > { %v303_v62 = vmul.f32 %v727_v51, %v302_v57 }
  0xb5   : > { %v289_v2 = vadd.f32 %v725_v50, %v288_v59 }
  0xb6   : > { %v304_v6 = vadd.f32 %v727_v51, %v303_v62 }
  0xb7   : > { %v293_v8 = vsel %vm292_vm3, %v725_v50, %v289_v2 }
  0xb8   : > { %v298_v11 = vsel %vm295_vm5, %v297_v5, %v293_v8  ;;  %v308_v12 = vsel %vm307_vm6, %v727_v51, %v304_v6 }
  0xb9   : > { %v313_v14 = vsel %vm310_vm7, %v312_v9, %v308_v12  ;;  %v948_v15 = vmul.f32 %v298_v11, %v275_v42 }
  0xba   : > { %v950_v16 = vmul.f32 %v313_v14, %v276_v43 }
  0xbb   : > { %v415_v18 = vmul.f32 %v935_v0, %v948_v15  ;;  %v368_v19 = vmul.f32 %v939_v4, %v948_v15  ;;  %v325_v20 = vmul.f32 %v944_v10, %v948_v15  ;;  %v317_v26 = vmul.f32 %v948_v15, %v948_v15 }
  0xbc   : > { %v416_v21 = vmul.f32 %v937_v3, %v950_v16  ;;  %v369_v22 = vmul.f32 %v941_v7, %v950_v16  ;;  %v326_v23 = vmul.f32 %v946_v13, %v950_v16  ;;  %v318_v30 = vmul.f32 %v950_v16, %v950_v16 }
  0xbd   : > { %v462_v31 = vmul.f32 %v964_v24, %v948_v15  ;;  %v463_v32 = vmul.f32 %v966_v25, %v950_v16  ;;  %v467_v33 = vmul.f32 %v964_v24, %v317_v26  ;;  %v330_v35 = vmul.f32 %v944_v10, %v317_v26 }
  0xbe   : > { %v417_v27 = vadd.f32 %v416_v21, %v415_v18  ;;  %v370_v28 = vadd.f32 %v369_v22, %v368_v19  ;;  %v327_v29 = vadd.f32 %v326_v23, %v325_v20  ;;  %v468_v34 = vmul.f32 %v966_v25, %v318_v30 }
  0xbf   : > { %v331_v36 = vmul.f32 %v946_v13, %v318_v30  ;;  %v464_v37 = vadd.f32 %v463_v32, %v462_v31  ;;  %v373_v40 = vmul.f32 %v939_v4, %v317_v26  ;;  %v374_v41 = vmul.f32 %v941_v7, %v318_v30 }
  0xc0   : > { %418 = vadd.xlane.f32.xlu0 %v417_v27  ;;  %371 = vadd.xlane.f32.xlu1 %v370_v28  ;;  %v469_v38 = vadd.f32 %v468_v34, %v467_v33  ;;  %v420_v43 = vmul.f32 %v935_v0, %v317_v26  ;;  %v421_v44 = vmul.f32 %v937_v3, %v318_v30 }
  0xc1   : > { %328 = vadd.xlane.f32.xlu2 %v327_v29  ;;  %v332_v39 = vadd.f32 %v331_v36, %v330_v35  ;;  %v375_v42 = vadd.f32 %v374_v41, %v373_v40 }
  0xc2   : > { %v422_v45 = vadd.f32 %v421_v44, %v420_v43 }
  0xc8   : > { %465 = vadd.xlane.f32.xlu1 %v464_v37  ;;  %470 = vadd.xlane.f32.xlu0 %v469_v38 }
  0xc9   : > { %333 = vadd.xlane.f32.xlu2 %v332_v39 }
  0xd1   : > { %376 = vadd.xlane.f32.xlu2 %v375_v42 }
  0xd9   : > { %423 = vadd.xlane.f32.xlu2 %v422_v45 }
 0x133   : > { %v372_v46 = vpop.xlane.xlu1 %371  ;;  %v419_v48 = vpop.xlane.xlu0 %418 }
 0x134   : > { %v329_v47 = vpop.xlane.xlu2 %328  ;;  %v378_v56 = vmul.f32 0.015625, %v372_v46  ;;  %v425_v9 = vmul.f32 0.015625, %v419_v48 }
 0x135   : > { %v335_v49 = vmul.f32 0.015625, %v329_v47 }
 0x136   : > { %v379_v62 = vmul.f32 %v378_v56, %v372_v46  ;;  %v426_v14 = vmul.f32 %v425_v9, %v419_v48  ;;  %v400_v34 = vmul.f32 %v378_v56, %v939_v4  ;;  %v401_v35 = vmul.f32 %v378_v56, %v941_v7 }
 0x137   : > { %v336_v50 = vmul.f32 %v335_v49, %v329_v47  ;;  %v357_v36 = vmul.f32 %v335_v49, %v944_v10  ;;  %v358_v37 = vmul.f32 %v335_v49, %v946_v13  ;;  %v447_v44 = vmul.f32 %v425_v9, %v935_v0 }
 0x138   : > { %v448_v45 = vmul.f32 %v425_v9, %v937_v3 }
 0x139   : > { %v402_v42 = vadd.f32 %v400_v34, %v357_v36  ;;  %v403_v43 = vadd.f32 %v401_v35, %v358_v37 }
 0x13b   : > { %v466_v51 = vpop.xlane.xlu1 %465  ;;  %v471_v57 = vpop.xlane.xlu0 %470  ;;  %v450_v56 = vadd.f32 %v448_v45, %v403_v43 }
 0x13c   : > { %v984_v52 = vmul.f32 0.015625, %v466_v51  ;;  %v334_v53 = vpop.xlane.xlu2 %333 }
 0x13d   : > { %v337_v54 = vsub.f32 %v334_v53, %v336_v50 }
 0x13e   : > { %v473_v55 = vmul.f32 %v984_v52, %v466_v51 }
 0x13f   : > { %v338_v58 = vmax.f32 %v337_v54, 0.0 }
 0x140   : > { %v474_v59 = vsub.f32 %v471_v57, %v473_v55  ;;  %v449_v55 = vadd.f32 %v447_v44, %v402_v42  ;;  %v494_v57 = vmul.f32 %v984_v52, %v964_v24 }
 0x141   : > { %v339_v60 = vmul.f32 0.015873017, %v338_v58  ;;  %v495_v58 = vmul.f32 %v984_v52, %v966_v25 }
 0x142   : > { %v475_v61 = vmax.f32 %v474_v59, 0.0 }
 0x143   : > { %v340_v63 = vadd.f32 0.0001, %v339_v60 }
 0x144   : > { %v476_v1 = vmul.f32 0.015873017, %v475_v61  ;;  %v377_v2 = vpop.xlane.xlu2 %376 }
 0x145   : > { %v987_v5 = vmul.f32 4.0, %v340_v63  ;;  %v380_v6 = vsub.f32 %v377_v2, %v379_v62 }
 0x146   : > { %v477_v8 = vadd.f32 0.0001, %v476_v1 }
 0x147   : > { %v381_v12 = vmax.f32 %v380_v6, 0.0  ;;  %728 = vrcp.f32 %v987_v5  ;;  %v353_v48 = vand.u32 2147483648, %v987_v5  ;;  %vm347_vm12 = vweird.f32 %v987_v5 }
 0x148   : > { %v989_v11 = vmul.f32 4.0, %v477_v8  ;;  %v351_v60 = vand.u32 2147483647, %v987_v5 }
 0x149   : > { %v382_v17 = vmul.f32 0.015873017, %v381_v12  ;;  %v354_v1 = vor.u32 1.1754944e-38, %v353_v48 }
 0x14a   : > { %730 = vrcp.f32 %v989_v11  ;;  %vm484_vm15 = vweird.f32 %v989_v11  ;;  %v488_v8 = vand.u32 2147483647, %v989_v11  ;;  %v490_v9 = vand.u32 2147483648, %v989_v11 }
 0x14b   : > { %v383_v19 = vadd.f32 0.0001, %v382_v17  ;;  %vm352_vm2 = vcmp.eq.f32.partialorder %v351_v60, 8.507059e+37 }
 0x14c   : > { %v424_v18 = vpop.xlane.xlu2 %423  ;;  %vm489_vm5 = vcmp.eq.f32.partialorder %v488_v8, 8.507059e+37 }
 0x14d   : > { %v427_v20 = vsub.f32 %v424_v18, %v426_v14  ;;  %v993_v21 = vpop.eup %728  ;;  %v384_v22 = vmul.f32 4.0, %v383_v19 }
 0x14e   : > { %v343_v27 = vmul.f32 %v993_v21, %v987_v5  ;;  %vm348_vm9 = vweird.f32 %v993_v21 }
 0x14f   : > { %v428_v23 = vmax.f32 %v427_v20, 0.0  ;;  %732 = vrcp.f32 %v384_v22  ;;  %v396_v49 = vand.u32 2147483648, %v384_v22  ;;  %vm390_vm10 = vweird.f32 %v384_v22  ;;  %vm1032_vm14 = vmor %vm347_vm12, %vm348_vm9 }
 0x150   : > { %v995_v26 = vpop.eup %730  ;;  %v344_v31 = vsub.f32 1.0, %v343_v27  ;;  %v394_v53 = vand.u32 2147483647, %v384_v22  ;;  %v496_v20 = vadd.f32 %v494_v57, %v449_v55 }
 0x151   : > { %v429_v28 = vmul.f32 0.015873017, %v428_v23  ;;  %v480_v30 = vmul.f32 %v995_v26, %v989_v11  ;;  %vm485_vm13 = vweird.f32 %v995_v26  ;;  %v397_v2 = vor.u32 1.1754944e-38, %v396_v49 }
 0x152   : > { %v345_v40 = vmul.f32 %v993_v21, %v344_v31  ;;  %vm395_vm0 = vcmp.eq.f32.partialorder %v394_v53, 8.507059e+37  ;;  %vm1043_vm1 = vmor %vm484_vm15, %vm485_vm13 }
 0x153   : > { %v430_v29 = vadd.f32 0.0001, %v429_v28  ;;  %v481_v39 = vsub.f32 1.0, %v480_v30 }
 0x154   : > { %v346_v50 = vadd.f32 %v993_v21, %v345_v40 }
 0x155   : > { %v1001_v32 = vmul.f32 4.0, %v430_v29  ;;  %v733_v33 = vpop.eup %732  ;;  %v482_v47 = vmul.f32 %v995_v26, %v481_v39  ;;  %v491_v29 = vor.u32 1.1754944e-38, %v490_v9 }
 0x156   : > { %v386_v38 = vmul.f32 %v733_v33, %v384_v22  ;;  %vm391_vm8 = vweird.f32 %v733_v33  ;;  %v350_v5 = vsel %vm1032_vm14, %v993_v21, %v346_v50  ;;  %v497_v21 = vadd.f32 %v495_v58, %v450_v56 }
 0x157   : > { %734 = vrcp.f32 %v1001_v32  ;;  %vm1019_vm11 = vmor %vm390_vm10, %vm391_vm8  ;;  %v483_v63 = vadd.f32 %v995_v26, %v482_v47  ;;  %v443_v14 = vand.u32 2147483648, %v1001_v32  ;;  %v441_v19 = vand.u32 2147483647, %v1001_v32 }
 0x158   : > { %v387_v41 = vsub.f32 1.0, %v386_v38  ;;  %v355_v23 = vsel %vm352_vm2, %v354_v1, %v350_v5  ;;  %vm437_vm4 = vweird.f32 %v1001_v32  ;;  %v503_v35 = vsub.f32 %v950_v16, %v497_v21 }
 0x159   : > { %v487_v22 = vsel %vm1043_vm1, %v995_v26, %v483_v63  ;;  %v444_v30 = vor.u32 1.1754944e-38, %v443_v14  ;;  %v359_v31 = vmul.f32 %v355_v23, %v944_v10  ;;  %vm442_vm7 = vcmp.eq.f32.partialorder %v441_v19, 8.507059e+37 }
 0x15a   : > { %v388_v46 = vmul.f32 %v733_v33, %v387_v41  ;;  %v502_v26 = vsub.f32 %v948_v15, %v496_v20  ;;  %v505_v42 = vmul.f32 %v503_v35, %v503_v35 }
 0x15c   : > { %v389_v51 = vadd.f32 %v733_v33, %v388_v46  ;;  %v504_v41 = vmul.f32 %v502_v26, %v502_v26 }
 0x15d   : > { %v735_v54 = vpop.eup %734 }
 0x15e   : > { %v393_v61 = vsel %vm1019_vm11, %v733_v33, %v389_v51  ;;  %v433_v62 = vmul.f32 %v735_v54, %v1001_v32  ;;  %vm438_vm3 = vweird.f32 %v735_v54  ;;  %v360_v33 = vmul.f32 %v355_v23, %v946_v13 }
 0x15f   : > { %v398_v12 = vsel %vm395_vm0, %v397_v2, %v393_v61  ;;  %vm439_vm6 = vmor %vm437_vm4, %vm438_vm3 }
 0x160   : > { %v434_v6 = vsub.f32 1.0, %v433_v62  ;;  %v404_v11 = vmul.f32 %v398_v12, %v939_v4  ;;  %v405_v27 = vmul.f32 %v398_v12, %v941_v7  ;;  %v492_v4 = vsel %vm489_vm5, %v491_v29, %v487_v22 }
 0x161   : > { %v498_v39 = vmul.f32 %v492_v4, %v964_v24  ;;  %v499_v10 = vmul.f32 %v492_v4, %v966_v25 }
 0x162   : > { %v435_v18 = vmul.f32 %v735_v54, %v434_v6  ;;  %v406_v7 = vadd.f32 %v404_v11, %v359_v31  ;;  %v407_v37 = vadd.f32 %v405_v27, %v360_v33 }
 0x164   : > { %v436_v28 = vadd.f32 %v735_v54, %v435_v18 }
 0x166   : > { %v440_v34 = vsel %vm439_vm6, %v735_v54, %v436_v28 }
 0x167   : > { %v445_v36 = vsel %vm442_vm7, %v444_v30, %v440_v34 }
 0x168   : > { %v451_v32 = vmul.f32 %v445_v36, %v935_v0  ;;  %v452_v38 = vmul.f32 %v445_v36, %v937_v3 }
 0x16a   : > { %v453_v40 = vadd.f32 %v451_v32, %v406_v7  ;;  %v454_v13 = vadd.f32 %v452_v38, %v407_v37 }
 0x16c   : > { %v500_v43 = vadd.f32 %v498_v39, %v453_v40  ;;  %v501_v44 = vadd.f32 %v499_v10, %v454_v13 }
 0x16e   : > { %v506_v45 = vmul.f32 %v504_v41, %v500_v43  ;;  %v507_v46 = vmul.f32 %v505_v42, %v501_v44 }
 0x170   : > { %v508_v47 = vadd.f32 0.5, %v506_v45  ;;  %v509_v48 = vadd.f32 0.5, %v507_v46 }
 0x172   : > { %v651_v49 = vmul.f32 -1.442695, %v508_v47  ;;  %v652_v0 = vmul.f32 -1.442695, %v509_v48 }
 0x174   : > { %736 = vpow2.f32 %v651_v49 }
 0x175   : > { %738 = vpow2.f32 %v652_v0 }
 0x17a   : > { %v737_v3 = vpop.eup %736 }
 0x17b   : > { %v739_v24 = vpop.eup %738  ;;  %v516_v25 = vadd.f32 1.0, %v737_v3 }
 0x17c   : > { %v517_v50 = vadd.f32 1.0, %v739_v24 }
 0x17d   : > { %740 = vrcp.f32 %v516_v25  ;;  %v529_v57 = vand.u32 2147483648, %v516_v25  ;;  %v527_v60 = vand.u32 2147483647, %v516_v25  ;;  %vm523_vm10 = vweird.f32 %v516_v25 }
 0x17e   : > { %742 = vrcp.f32 %v517_v50  ;;  %v544_v61 = vand.u32 2147483648, %v517_v50  ;;  %v542_v63 = vand.u32 2147483647, %v517_v50  ;;  %vm538_vm12 = vweird.f32 %v517_v50 }
 0x17f   : > { %v530_v1 = vor.u32 1.1754944e-38, %v529_v57  ;;  %vm528_vm13 = vcmp.eq.f32.partialorder %v527_v60, 8.507059e+37 }
 0x180   : > { %v545_v6 = vor.u32 1.1754944e-38, %v544_v61  ;;  %vm543_vm15 = vcmp.eq.f32.partialorder %v542_v63, 8.507059e+37 }
 0x183   : > { %v741_v51 = vpop.eup %740 }
 0x184   : > { %v743_v53 = vpop.eup %742  ;;  %v519_v54 = vmul.f32 %v741_v51, %v516_v25  ;;  %vm524_vm8 = vweird.f32 %v741_v51 }
 0x185   : > { %v534_v55 = vmul.f32 %v743_v53, %v517_v50  ;;  %vm539_vm9 = vweird.f32 %v743_v53  ;;  %vm525_vm11 = vmor %vm523_vm10, %vm524_vm8 }
 0x186   : > { %v520_v56 = vsub.f32 1.0, %v519_v54  ;;  %vm540_vm14 = vmor %vm538_vm12, %vm539_vm9 }
 0x187   : > { %v535_v58 = vsub.f32 1.0, %v534_v55 }
 0x188   : > { %v521_v59 = vmul.f32 %v741_v51, %v520_v56 }
 0x189   : > { %v536_v62 = vmul.f32 %v743_v53, %v535_v58 }
 0x18a   : > { %v522_v52 = vadd.f32 %v741_v51, %v521_v59 }
 0x18b   : > { %v537_v2 = vadd.f32 %v743_v53, %v536_v62 }
 0x18c   : > { %v526_v5 = vsel %vm525_vm11, %v741_v51, %v522_v52 }
 0x18d   : > { %v531_v8 = vsel %vm528_vm13, %v530_v1, %v526_v5  ;;  %v541_v9 = vsel %vm540_vm14, %v743_v53, %v537_v2 }
 0x18e   : > { %v546_v12 = vsel %vm543_vm15, %v545_v6, %v541_v9  ;;  %v548_v14 = vmul.f32 %v531_v8, %v948_v15 }
 0x18f   : > { %v549_v17 = vmul.f32 %v546_v12, %v950_v16 }
 0x190   : > { %550 = vst [vmem:[%s205_s19] sm:$0xff] %v548_v14 }
 0x191   : > { %551 = vst [vmem:[%s205_s19 + $0x8] sm:$0xff] %v549_v17 }
 0x192   : > { %801 = shalt.err (!%p798_p8)
}
 0x193   : > { %664 = dma.vmem_to_hbm [thread:$0]  (%p910_p5), %s567_s30, 256, %s569_s5, %s553_s6  }
 0x194 PF: > { %p676_p9 = scmp.ge.s32.totalorder %s840_s18, 2  ;;  %s580_s14 = sand.u32 1, %s828_s15  }
 0x195   : > { %s581_s20 = scalar_lea.sflag [#allocation4], %s580_s14 }
 0x196   : > { %p671_p10 = pnand %p676_p9, %p914_p6 }
 0x198   : > { %p672_p11 = pneg %p671_p10 }
 0x19a   : > { %823 = dma.done.wait (%p672_p11), %s581_s20, 256  }
 0x19b   : > { %825 = vsyncadd (%p672_p11), %s581_s20, 4294967040  ;;  %p15_p12 = scmp.ge.s32.totalorder %s897_s21, 4   ;;  %s1113_s15 = smov %s832_s16 }
 0x19c   : > { %s1114_s16 = smov %s836_s17  ;;  %s1115_s17 = smov %s908_s24 }
 0x19d   : > { %s1116_s18 = smov %s897_s21  ;;  %17 = sbr.rel (!%p15_p12) target bundleno = 4 (0x4), region = 79 }
 0x1a2   :  { %587 = vsyncpa [#allocation3], 1 }
 0x1a3   :  { %589 = vsyncpa [#allocation3 + $0x1], 1 }
 0x1a4   :  { %590 = vsyncpa [#allocation4], 1 }
 0x1a5   :  { %592 = vsyncpa [#allocation4 + $0x1], 1 }

</bundles_post_ra>
